<compile_context>
chip_gen: v6e
topology: v6e:2x2x1
jax: 0.10.0
libtpu: 0.0.40
codegen_flags: <defaults>
</compile_context>

<pallas_src>
import jax
import jax.numpy as jnp
from jax.experimental import pallas as pl
from jax.experimental.pallas import tpu as pltpu


def _linear_kernel(x_ref, w_ref, b_ref, o_ref):
    # (TILE_R, P*F) @ (P*F, P*2) on the MXU, f32 accumulation, bias add on VPU.
    acc = jnp.dot(x_ref[...], w_ref[...], preferred_element_type=jnp.float32)
    o_ref[...] = (acc + b_ref[...]).astype(o_ref.dtype)


def parenthesization_forward(x, weight, bias, *, max_tile_rows=4096):
    """Forward pass of ParenthesizationModel.

    x:      (B, F) float32, F = 2*2*n
    weight: (2, F) float32 (PyTorch nn.Linear layout)
    bias:   (2,)   float32
    returns (B, 2) float32  ==  x @ weight.T + bias
    """
    B, F = x.shape
    O = weight.shape[0]  # = 2
    dtype = x.dtype

    # --- lane densification: pack P batch rows per packed row -----------------
    if F <= 128 and 128 % F == 0:
        P = 128 // F
    else:
        P = 1

    # rows of the packed matrix
    R = -(-B // P)
    # tile size on the packed-row axis (multiple of 8 sublanes, capped)
    TILE_R = min(max_tile_rows, ((R + 7) // 8) * 8)
    R_pad = ((R + TILE_R - 1) // TILE_R) * TILE_R
    B_pad = R_pad * P

    if B_pad != B:
        x = jnp.pad(x, ((0, B_pad - B), (0, 0)))
    # free row-major metadata reshape: P consecutive batch rows per packed row
    x_packed = x.reshape(R_pad, P * F)

    # block-diagonal weight: W_bd[p*F:(p+1)*F, p*O:(p+1)*O] = weight.T
    w_t = weight.T.astype(dtype)                         # (F, O)
    w_bd = jnp.kron(jnp.eye(P, dtype=dtype), w_t)        # (P*F, P*O)
    b_tiled = jnp.tile(bias.astype(dtype), P).reshape(1, P * O)

    num_tiles = R_pad // TILE_R

    cost = pl.CostEstimate(
        flops=2 * B * F * O,
        transcendentals=0,
        bytes_accessed=B * F * 4 + F * O * 4 + B * O * 4,
    )

    out_packed = pl.pallas_call(
        _linear_kernel,
        out_shape=jax.ShapeDtypeStruct((R_pad, P * O), dtype),
        grid=(num_tiles,),
        in_specs=[
            # streamed, double-buffered x tiles (the roofline term)
            pl.BlockSpec((TILE_R, P * F), lambda i: (i, 0)),
            # weight / bias stay resident in VMEM across the grid
            pl.BlockSpec((P * F, P * O), lambda i: (0, 0)),
            pl.BlockSpec((1, P * O), lambda i: (0, 0)),
        ],
        out_specs=pl.BlockSpec((TILE_R, P * O), lambda i: (i, 0)),
        compiler_params=pltpu.CompilerParams(
            dimension_semantics=("parallel",),
        ),
        cost_estimate=cost,
    )(x_packed, w_bd, b_tiled)

    # unpack: (R_pad, P*O) -> (B_pad, O) -> (B, O)
    out = out_packed.reshape(B_pad, O)[:B]
    return out


parenthesization_forward_jit = jax.jit(
    parenthesization_forward, static_argnames=("max_tile_rows",)
)


if __name__ == "__main__":
    n = 8                        # model hyperparameter -> in_features = 2*2*n = 32
    in_features = 2 * 2 * n
    out_features = 2
    batch = 8

    key = jax.random.PRNGKey(0)
    kx, kw, kb = jax.random.split(key, 3)

    # Deterministic init mimicking nn.Linear's uniform(-1/sqrt(in), 1/sqrt(in)).
    bound = 1.0 / jnp.sqrt(jnp.float32(in_features))
    weight = jax.random.uniform(kw, (out_features, in_features),
                                minval=-bound, maxval=bound, dtype=jnp.float32)
    bias = jax.random.uniform(kb, (out_features,),
                              minval=-bound, maxval=bound, dtype=jnp.float32)

    x = jax.random.normal(kx, (batch, in_features), dtype=jnp.float32)

    out = parenthesization_forward_jit(x, weight, bias)
    out = jax.block_until_ready(out)

    # Reference check (plain JAX) to verify nn.Linear semantics.
    ref = x @ weight.T + bias
    assert out.shape == (batch, out_features)
    assert jnp.allclose(out, ref, atol=1e-5, rtol=1e-5), (
        f"max err {jnp.max(jnp.abs(out - ref))}")

    # Also exercise a batch that is not a multiple of the packing/tile factors.
    x2 = jax.random.normal(kx, (batch + 3, in_features), dtype=jnp.float32)
    out2 = jax.block_until_ready(parenthesization_forward_jit(x2, weight, bias))
    ref2 = x2 @ weight.T + bias
    assert jnp.allclose(out2, ref2, atol=1e-5, rtol=1e-5)

    print("KERNEL_OK")
</pallas_src>

<mosaic_0001>
module attributes {stable_mosaic.version = 11 : i64} {
  func.func @_linear_kernel(%arg0: i32, %arg1: memref<8x128xf32, #tpu.memory_space<vmem>>, %arg2: memref<128x8xf32, #tpu.memory_space<vmem>>, %arg3: memref<1x8xf32, #tpu.memory_space<vmem>>, %arg4: memref<8x8xf32, #tpu.memory_space<vmem>>) attributes {dimension_semantics = [#tpu.dimension_semantics<parallel>], iteration_bounds = array<i64: 1>, scalar_prefetch = 0 : i64, scratch_operands = 0 : i64, tpu.core_type = #tpu.core_type<tc>, window_params = [{transform_indices = @transform_0, window_bounds = array<i64: 8, 128>}, {pipeline_mode = #tpu.pipeline_mode<synchronous>, transform_indices = @transform_1, window_bounds = array<i64: 128, 8>}, {pipeline_mode = #tpu.pipeline_mode<synchronous>, transform_indices = @transform_2, window_bounds = array<i64: 1, 8>}, {transform_indices = @transform_3, window_bounds = array<i64: 8, 8>}]} {
    %c0 = arith.constant 0 : index
    %c0_0 = arith.constant 0 : index
    %0 = vector.load %arg1[%c0, %c0_0] : memref<8x128xf32, #tpu.memory_space<vmem>>, vector<8x128xf32>
    %c0_1 = arith.constant 0 : index
    %c0_2 = arith.constant 0 : index
    %1 = vector.load %arg2[%c0_1, %c0_2] : memref<128x8xf32, #tpu.memory_space<vmem>>, vector<128x8xf32>
    %cst = arith.constant dense<0.000000e+00> : vector<8x8xf32>
    %2 = tpu.matmul %0, %1, %cst {dimension_numbers = #tpu.dot_dimension_numbers<[1], [0], [0], [1], [0, 0, 1, 1], [], []>} : vector<8x128xf32>, vector<128x8xf32>, vector<8x8xf32> -> vector<8x8xf32>
    %c0_3 = arith.constant 0 : index
    %c0_4 = arith.constant 0 : index
    %3 = vector.load %arg3[%c0_3, %c0_4] : memref<1x8xf32, #tpu.memory_space<vmem>>, vector<1x8xf32>
    %4 = vector.broadcast %3 : vector<1x8xf32> to vector<8x8xf32>
    %5 = arith.addf %2, %4 : vector<8x8xf32>
    %c0_5 = arith.constant 0 : index
    %c0_6 = arith.constant 0 : index
    %6 = vector.load %arg4[%c0_5, %c0_6] : memref<8x8xf32, #tpu.memory_space<vmem>>, vector<8x8xf32>
    tpu.vector_store %arg4[%c0_5, %c0_6], %5 {strides = array<i32>} : memref<8x8xf32, #tpu.memory_space<vmem>>, vector<8x8xf32>,
    return
  }
  func.func @transform_0(%arg0: i32) -> (i32, i32) {
    %c0_i32 = arith.constant 0 : i32
    %c0_i32_0 = arith.constant 0 : i32
    return %arg0, %c0_i32 : i32, i32
  }
  func.func @transform_1(%arg0: i32) -> (i32, i32) {
    %c0_i32 = arith.constant 0 : i32
    %c0_i32_0 = arith.constant 0 : i32
    %c0_i32_1 = arith.constant 0 : i32
    return %c0_i32, %c0_i32_0 : i32, i32
  }
  func.func @transform_2(%arg0: i32) -> (i32, i32) {
    %c0_i32 = arith.constant 0 : i32
    %c0_i32_0 = arith.constant 0 : i32
    %c0_i32_1 = arith.constant 0 : i32
    return %c0_i32, %c0_i32_0 : i32, i32
  }
  func.func @transform_3(%arg0: i32) -> (i32, i32) {
    %c0_i32 = arith.constant 0 : i32
    %c0_i32_0 = arith.constant 0 : i32
    return %arg0, %c0_i32 : i32, i32
  }
}

</mosaic_0001>

<bundles_post_ra>
// kernel: tile.8
= control target key start
LH: loop header
LB: loop body
LE: loop exit
PB: predicated region body
PF: predicated region fallthrough
CT: control target
= control target key end

     0   :  { %s22_s0 = inlined_call_operand.vmem [shape: f32[2], index: 0, kind: input, shape index: {}]   ;;  %s23_s1 = inlined_call_operand.vmem [shape: f32[4,2], index: 1, kind: output, shape index: {}]  }
   0x1   :  { %v4_v0 = vld [vmem:[%s22_s0] ss:$0 sm:$0xff] }
   0x2   :  { %5 = vst [vmem:[%s23_s1] sm:$0xf] %v4_v0 }

// kernel: tile.9
= control target key start
LH: loop header
LB: loop body
LE: loop exit
PB: predicated region body
PF: predicated region fallthrough
CT: control target
= control target key end

     0   :  { %vm8_vm0 = vcmask 15360   ;;  %s40_s8 = smov 2   ;;  %s41_s9 = smov 4   ;;  %vm14_vm1 = vcmask 64560   ;;  %vm20_vm2 = vcmask 48160   ;;  %vm26_vm3 = vcmask 31760   ;;  %s58_s0 = inlined_call_operand.vmem [shape: f32[4,2], index: 0, kind: input, shape index: {}]   ;;  %s59_s1 = inlined_call_operand.vmem [shape: f32[1,8], index: 1, kind: output, shape index: {}]  }
   0x1   :  { %v5_v0 = vld [vmem:[%s58_s0] sm:$0xf]  ;;  %s39_s0 = smov 6  }
   0x2   :  { %6 = vst [vmem:[#allocation1] sm:$0xf] %v5_v0 }
   0x9   :  { %v11_v1 = vld [vmem:[#allocation1 + $0x3] sm:$0x1]   ;;  %v23_v2 = vld [vmem:[#allocation1 + $0x1] sm:$0x1]   ;;  %v7_v3 = vld [vmem:[#allocation1] sm:$0x1]  }
   0xa   :  { %12 = vrot.lane.b32.xlu0 %v11_v1, %s39_s0  ;;  %24 = vrot.lane.b32.xlu1 %v23_v2, %s40_s8  ;;  %v17_v4 = vld [vmem:[#allocation1 + $0x2] sm:$0x1]   ;;  %9 = vst.msk [vmem:[#allocation0] sm:$0x1] %vm8_vm0, %v7_v3  }
   0xe   :  { %18 = vrot.lane.b32.xlu0 %v17_v4, %s41_s9 }
  0x7c   :  { %v13_v5 = vpop.permute.xlu0 %12   ;;  %v25_v6 = vpop.permute.xlu1 %24  }
  0x7d   :  { %15 = vst.msk [vmem:[#allocation0] sm:$0x1] %vm14_vm1, %v13_v5  }
  0x80   :  { %v19_v7 = vpop.permute.xlu0 %18  }
  0x81   :  { %21 = vst.msk [vmem:[#allocation0] sm:$0x1] %vm20_vm2, %v19_v7  }
  0x82   :  { %27 = vst.msk [vmem:[#allocation0] sm:$0x1] %vm26_vm3, %v25_v6  }
  0x89   :  { %v32_v8 = vld [vmem:[#allocation0] sm:$0x1] }
  0x8a   :  { %35 = vst [vmem:[%s59_s1] sm:$0x1] %v32_v8 }

// kernel: parenthesization_forward.1
= control target key start
LH: loop header
LB: loop body
LE: loop exit
PB: predicated region body
PF: predicated region fallthrough
CT: control target
= control target key end

     0   :  { %v169_v0 = vmov 0.0   ;;  %vm170_vm0 = vmmov 0   ;;  %vm108_vm1 = vcmask 64512   ;;  %s248_s1 = inlined_call_operand.vmem [shape: f32[128,8], index: 1, kind: input, shape index: {}]   ;;  %s249_s0 = inlined_call_operand.vmem [shape: f32[8,128], index: 0, kind: input, shape index: {}]   ;;  %s250_s2 = inlined_call_operand.vmem [shape: f32[1,8], index: 2, kind: input, shape index: {}]   ;;  %s251_s3 = inlined_call_operand.vmem [shape: f32[8,8], index: 3, kind: output, shape index: {}]  }
   0x1   :  { %132 = vmatprep.subr.mxu0 %v169_v0  ;;  %v30_v1 = vld [vmem:[%s248_s1 + $0x78] sm:$0xff]  ;;  %v29_v2 = vld [vmem:[%s248_s1 + $0x70] sm:$0xff]  ;;  %164 = vmatprep.mubr.msk.f32.mxu0 %vm170_vm0, %v169_v0  ;;  %v28_v3 = vld [vmem:[%s248_s1 + $0x68] sm:$0xff] }
   0x2   :  { %133 = vmatpush3.msra.mxu0 %v30_v1  ;;  %v27_v4 = vld [vmem:[%s248_s1 + $0x60] sm:$0xff]  ;;  %v26_v5 = vld [vmem:[%s248_s1 + $0x58] sm:$0xff]  ;;  %v25_v6 = vld [vmem:[%s248_s1 + $0x50] sm:$0xff] }
   0x3   :  { %134 = vmatprep.subr.mxu0 %v169_v0  ;;  %v24_v7 = vld [vmem:[%s248_s1 + $0x48] sm:$0xff]  ;;  %v23_v8 = vld [vmem:[%s248_s1 + $0x40] sm:$0xff]  ;;  %v22_v9 = vld [vmem:[%s248_s1 + $0x38] sm:$0xff] }
   0x4   :  { %135 = vmatpush3.msra.mxu0 %v29_v2  ;;  %v21_v10 = vld [vmem:[%s248_s1 + $0x30] sm:$0xff]  ;;  %v20_v11 = vld [vmem:[%s248_s1 + $0x28] sm:$0xff]  ;;  %v19_v12 = vld [vmem:[%s248_s1 + $0x20] sm:$0xff] }
   0x5   :  { %136 = vmatprep.subr.mxu0 %v169_v0  ;;  %v18_v13 = vld [vmem:[%s248_s1 + $0x18] sm:$0xff]  ;;  %v17_v14 = vld [vmem:[%s248_s1 + $0x10] sm:$0xff]  ;;  %v16_v15 = vld [vmem:[%s248_s1 + $0x8] sm:$0xff] }
   0x6   :  { %137 = vmatpush3.msra.mxu0 %v28_v3  ;;  %v15_v16 = vld [vmem:[%s248_s1] sm:$0xff] }
   0x7   :  { %138 = vmatprep.subr.mxu0 %v169_v0  ;;  %v14_v17 = vld [vmem:[%s249_s0] sm:$0xff] }
   0x8   :  { %139 = vmatpush3.msra.mxu0 %v27_v4  ;;  %v114_v18 = vld [vmem:[%s250_s2] ss:$0 sm:$0xff] }
   0x9   :  { %140 = vmatprep.subr.mxu0 %v169_v0 }
   0xa   :  { %141 = vmatpush3.msra.mxu0 %v26_v5 }
   0xb   :  { %142 = vmatprep.subr.mxu0 %v169_v0 }
   0xc   :  { %143 = vmatpush3.msra.mxu0 %v25_v6 }
   0xd   :  { %144 = vmatprep.subr.mxu0 %v169_v0 }
   0xe   :  { %145 = vmatpush3.msra.mxu0 %v24_v7 }
   0xf   :  { %146 = vmatprep.subr.mxu0 %v169_v0 }
  0x10   :  { %147 = vmatpush3.msra.mxu0 %v23_v8 }
  0x11   :  { %148 = vmatprep.subr.mxu0 %v169_v0 }
  0x12   :  { %149 = vmatpush3.msra.mxu0 %v22_v9 }
  0x13   :  { %150 = vmatprep.subr.mxu0 %v169_v0 }
  0x14   :  { %151 = vmatpush3.msra.mxu0 %v21_v10 }
  0x15   :  { %152 = vmatprep.subr.mxu0 %v169_v0 }
  0x16   :  { %153 = vmatpush3.msra.mxu0 %v20_v11 }
  0x17   :  { %154 = vmatprep.subr.mxu0 %v169_v0 }
  0x18   :  { %155 = vmatpush3.msra.mxu0 %v19_v12 }
  0x19   :  { %156 = vmatprep.subr.mxu0 %v169_v0 }
  0x1a   :  { %157 = vmatpush3.msra.mxu0 %v18_v13 }
  0x1b   :  { %158 = vmatprep.subr.mxu0 %v169_v0 }
  0x1c   :  { %159 = vmatpush3.msra.mxu0 %v17_v14 }
  0x1d   :  { %160 = vmatprep.subr.mxu0 %v169_v0 }
  0x1e   :  { %161 = vmatpush3.msra.mxu0 %v16_v15 }
  0x1f   :  { %162 = vmatprep.subr.mxu0 %v169_v0 }
  0x20   :  { %163 = vmatpush3.msra.mxu0 %v15_v16 }
  0x21   :  { %165 = vmatmul.mubr.f32.vlgmr.msra.gmra.mxu0 %v14_v17 }
  0xe1   :  { %v104_v19 = vpop.f32.mrf.mxu0 }
  0xe2   :  { %v105_v20 = vadd.f32 %v114_v18, %v104_v19 }
  0xe3   :  { %v166_v21 = vpop.f32.mrf.mxu0 }
  0xe4   :  { %109 = vst.msk [vmem:[%s251_s3] sm:$0xff] %vm108_vm1, %v105_v20 }

</bundles_post_ra>
